<compile_context>
chip_gen: v6e
topology: v6e:2x2x1
jax: 0.10.0
libtpu: 0.0.40
codegen_flags: <defaults>
</compile_context>

<pallas_src>
import jax
import jax.numpy as jnp
from jax.experimental import pallas as pl
from jax.experimental.pallas import tpu as pltpu


def _silu_kernel(x_ref, o_ref):
    x = x_ref[...]
    # Compute in f32 for accuracy; the kernel is HBM-bound so the cast is free.
    xf = x.astype(jnp.float32)
    o_ref[...] = (xf * jax.nn.sigmoid(xf)).astype(o_ref.dtype)


_LANE_CANDIDATES = (4096, 2048, 1024, 512, 256, 128)


def _generation_budget():
    """(target_block_bytes, vmem_limit_bytes) sized from the chip's VMEM."""
    try:
        vmem = pltpu.get_tpu_info().vmem_capacity_bytes
    except Exception:
        vmem = 128 * 1024 * 1024  # assume v5e/v6e class if the query fails
    if vmem >= 128 * 1024 * 1024:
        # v5e / v6e: 128 MiB physical VMEM -> big blocks, fewer grid steps.
        return 8 * 1024 * 1024, 48 * 1024 * 1024
    # v7x: 64 MiB per TensorCore -> keep blocks at ~4 MiB and leave headroom
    # for Mosaic internal scratch.
    return 4 * 1024 * 1024, 32 * 1024 * 1024


def nonlinearity(x, dropout=False):
    """Elementwise x * sigmoid(x), matching the PyTorch module (dropout=False)."""
    if dropout:
        raise NotImplementedError("dropout branch not implemented in Pallas port")

    orig_shape = x.shape
    orig_dtype = x.dtype
    itemsize = jnp.dtype(orig_dtype).itemsize

    flat = x.reshape(-1)  # contiguous reshape: free (no HBM pass)
    n = flat.shape[0]

    # Misaligned element counts: a pad + kernel + slice pipeline would move the
    # tensor through HBM three times; the fused XLA expression does one pass
    # and always wins, so just fall back.
    if n == 0 or n % 128 != 0:
        xf = x.astype(jnp.float32)
        return (xf * jax.nn.sigmoid(xf)).astype(orig_dtype)

    target_block_bytes, vmem_limit_bytes = _generation_budget()

    # Wide lane (last) dim: biggest candidate that divides the element count
    # -> unmasked full-width stores, fewer DMA descriptors per byte.
    for lane in _LANE_CANDIDATES:
        if n % lane == 0:
            break
    rows = n // lane

    # Rows per block: aim for ~target_block_bytes, rounded to the dtype's
    # sublane tiling (8 for f32, 16 for bf16, 32 for int8).
    sublane = max(8, 32 // itemsize)
    target_rows = max(1, (target_block_bytes // itemsize) // lane)
    if target_rows >= rows:
        tile_rows = rows
    else:
        tile_rows = max(sublane, (target_rows // sublane) * sublane)

    # Guarantee >= 2 grid blocks whenever the row count allows it so the
    # 'parallel' axis can be sharded across v7x's two TensorCores (no effect on
    # single-TC v5e/v6e). A partial last block is handled by Pallas masking.
    if rows > sublane and pl.cdiv(rows, tile_rows) < 2:
        half = (rows + 1) // 2
        tile_rows = max(sublane, ((half + sublane - 1) // sublane) * sublane)
        if tile_rows >= rows:  # could not split while staying sublane-aligned
            tile_rows = rows

    x2d = flat.reshape(rows, lane)
    grid = (pl.cdiv(rows, tile_rows),)

    cost = pl.CostEstimate(
        flops=4 * n,                       # mul + sigmoid arithmetic, roughly
        transcendentals=n,                 # one exp per element
        bytes_accessed=2 * n * itemsize,   # read + write, HBM-bound
    )

    out2d = pl.pallas_call(
        _silu_kernel,
        out_shape=jax.ShapeDtypeStruct((rows, lane), orig_dtype),
        grid_spec=pltpu.PrefetchScalarGridSpec(
            num_scalar_prefetch=0,
            grid=grid,
            in_specs=[pl.BlockSpec((tile_rows, lane), lambda i: (i, 0))],
            out_specs=pl.BlockSpec((tile_rows, lane), lambda i: (i, 0)),
        ),
        compiler_params=pltpu.CompilerParams(
            dimension_semantics=("parallel",),  # megacore-shard the row axis
            vmem_limit_bytes=vmem_limit_bytes,
        ),
        cost_estimate=cost,
    )(x2d)

    return out2d.reshape(orig_shape)


if __name__ == "__main__":
    key = jax.random.PRNGKey(0)

    # NCHW input, like the PyTorch conv-stack context this module lives in.
    x = jax.random.normal(key, (2, 4, 16, 16), dtype=jnp.float32)
    out = jax.block_until_ready(nonlinearity(x))
    ref = x * jax.nn.sigmoid(x)
    assert out.shape == x.shape and out.dtype == x.dtype
    assert jnp.allclose(out, ref, atol=1e-5, rtol=1e-5)

    # Larger aligned input: exercises multi-block grid / row tiling.
    xl = jax.random.normal(jax.random.PRNGKey(2), (2, 64, 64, 64), dtype=jnp.float32)
    outl = jax.block_until_ready(nonlinearity(xl))
    refl = xl * jax.nn.sigmoid(xl)
    assert outl.shape == xl.shape and outl.dtype == xl.dtype
    assert jnp.allclose(outl, refl, atol=1e-5, rtol=1e-5)

    # Non-128-multiple element count: exercises the fused-XLA fallback path.
    x2 = jax.random.normal(jax.random.PRNGKey(1), (3, 5, 7, 11), dtype=jnp.float32)
    out2 = jax.block_until_ready(nonlinearity(x2))
    ref2 = x2 * jax.nn.sigmoid(x2)
    assert out2.shape == x2.shape and out2.dtype == x2.dtype
    assert jnp.allclose(out2, ref2, atol=1e-5, rtol=1e-5)

    print("KERNEL_OK")
</pallas_src>

<mosaic_0001>
module attributes {stable_mosaic.version = 11 : i64} {
  func.func @_silu_kernel(%arg0: i32, %arg1: memref<1x2048xf32, #tpu.memory_space<vmem>>, %arg2: memref<1x2048xf32, #tpu.memory_space<vmem>>) attributes {dimension_semantics = [#tpu.dimension_semantics<parallel>], iteration_bounds = array<i64: 1>, scalar_prefetch = 0 : i64, scratch_operands = 0 : i64, tpu.core_type = #tpu.core_type<tc>, window_params = [{transform_indices = @transform_0, window_bounds = array<i64: 1, 2048>}, {transform_indices = @transform_1, window_bounds = array<i64: 1, 2048>}]} {
    %c0 = arith.constant 0 : index
    %c0_0 = arith.constant 0 : index
    %0 = vector.load %arg1[%c0, %c0_0] : memref<1x2048xf32, #tpu.memory_space<vmem>>, vector<1x2048xf32>
    %1 = arith.negf %0 : vector<1x2048xf32>
    %2 = math.exp %1 : vector<1x2048xf32>
    %cst = arith.constant 1.000000e+00 : f32
    %3 = vector.broadcast %cst : f32 to vector<1x2048xf32>
    %4 = arith.addf %3, %2 : vector<1x2048xf32>
    %5 = arith.divf %3, %4 : vector<1x2048xf32>
    %6 = arith.mulf %0, %5 : vector<1x2048xf32>
    %c0_1 = arith.constant 0 : index
    %c0_2 = arith.constant 0 : index
    %7 = vector.load %arg2[%c0_1, %c0_2] : memref<1x2048xf32, #tpu.memory_space<vmem>>, vector<1x2048xf32>
    tpu.vector_store %arg2[%c0_1, %c0_2], %6 {strides = array<i32>} : memref<1x2048xf32, #tpu.memory_space<vmem>>, vector<1x2048xf32>,
    return
  }
  func.func @transform_0(%arg0: i32) -> (i32, i32) {
    %c0_i32 = arith.constant 0 : i32
    %c0_i32_0 = arith.constant 0 : i32
    return %arg0, %c0_i32 : i32, i32
  }
  func.func @transform_1(%arg0: i32) -> (i32, i32) {
    %c0_i32 = arith.constant 0 : i32
    %c0_i32_0 = arith.constant 0 : i32
    return %arg0, %c0_i32 : i32, i32
  }
}

</mosaic_0001>

<bundles_post_ra>
// kernel: tpu_custom_call.1
= control target key start
LH: loop header
LB: loop body
LE: loop exit
PB: predicated region body
PF: predicated region fallthrough
CT: control target
= control target key end

     0   :  { %6 = vsyncpa [#allocation3], 0  ;;  %s128_s0 = inlined_call_operand.hbm [shape: f32[1,2048], index: 0, kind: input, shape index: {}]   ;;  %s129_s1 = inlined_call_operand.hbm [shape: f32[1,2048], index: 1, kind: output, shape index: {}]  }
   0x1   :  { %7 = vsyncpa [#allocation4], 0  ;;  %s110_s6 = smov [#allocation2]  }
   0x2   :  { %s14_s7 = sshll.u32 %s110_s6, 4  ;;  %s15_s7 = int_to_ptr.vmem [resolvable:$true] %s14_s7 }
   0x3   :  { %s74_s8 = scalar_lea.vmem %s15_s7, 256  ;;  %p79_p1 = scmp.lt.s32.totalorder %s15_s7, %s15_s7 }
   0x4   :  { %p75_p0 = scmp.ne.s32.totalorder %s15_s7, %s74_s8  ;;  %p80_p2 = scmp.lt.s32.totalorder %s74_s8, %s74_s8 }
   0x6   :  { %p81_p3 = por %p80_p2, %p79_p1 }
   0x8   :  { %p82_p4 = pnand %p81_p3, %p75_p0 }
   0xa   :  { %85 = shalt.err (!%p82_p4)
}
   0xb   :  { %17 = dma.hbm_to_vmem [thread:$0]  %s128_s0, 256, %s15_s7, [#allocation3]  }
   0xc   :  { %106 = dma.done.wait [#allocation3], 256  }
   0xd   :  { %107 = vsyncadd [#allocation3], 4294967040  ;;  %v21_v0 = vld [vmem:[#allocation2] sm:$0xff]  ;;  %v22_v1 = vld [vmem:[#allocation2 + $0x8] sm:$0xff]  ;;  %s111_s11 = smov [#allocation5]  }
   0xe   :  { %v54_v2 = vmul.f32 -1.442695, %v21_v0  ;;  %v55_v3 = vmul.f32 -1.442695, %v22_v1  ;;  %s45_s12 = sshll.u32 %s111_s11, 4  ;;  %s46_s12 = int_to_ptr.vmem [resolvable:$true] %s45_s12 }
   0xf   :  { %s86_s0 = scalar_lea.vmem %s46_s12, 256  ;;  %p91_p6 = scmp.lt.s32.totalorder %s46_s12, %s46_s12 }
  0x10   :  { %58 = vpow2.f32 %v54_v2  ;;  %p87_p5 = scmp.ne.s32.totalorder %s46_s12, %s86_s0  ;;  %p92_p7 = scmp.lt.s32.totalorder %s86_s0, %s86_s0 }
  0x11   :  { %60 = vpow2.f32 %v55_v3 }
  0x12   :  { %p93_p8 = por %p92_p7, %p91_p6 }
  0x14   :  { %p94_p9 = pnand %p93_p8, %p87_p5 }
  0x1d   :  { %v59_v4 = vpop.eup %58 }
  0x1e   :  { %v61_v5 = vpop.eup %60  ;;  %v29_v6 = vadd.f32 1.0, %v59_v4 }
  0x1f   :  { %v30_v7 = vadd.f32 1.0, %v61_v5 }
  0x20   :  { %62 = vrcp.f32 %v29_v6 }
  0x21   :  { %64 = vrcp.f32 %v30_v7 }
  0x2d   :  { %v63_v8 = vpop.eup %62 }
  0x2e   :  { %v65_v9 = vpop.eup %64  ;;  %v35_v10 = vmul.f32 %v63_v8, %v21_v0 }
  0x2f   :  { %v36_v11 = vmul.f32 %v65_v9, %v22_v1 }
  0x30   :  { %37 = vst [vmem:[#allocation5] sm:$0xff] %v35_v10 }
  0x31   :  { %38 = vst [vmem:[#allocation5 + $0x8] sm:$0xff] %v36_v11 }
  0x32   :  { %97 = shalt.err (!%p94_p9)
}
  0x33   :  { %48 = dma.vmem_to_hbm [thread:$0]  %s46_s12, 256, %s129_s1, [#allocation4]  }
  0x34   :  { %108 = dma.done.wait [#allocation4], 256  }
  0x35   :  { %109 = vsyncadd [#allocation4], 4294967040 }
  0x36   :  { %52 = vsyncpa [#allocation3], 1 }
  0x37   :  { %53 = vsyncpa [#allocation4], 1 }

</bundles_post_ra>
